<compile_context>
chip_gen: v7x
topology: tpu7x:2x2x1
jax: 0.10.0
libtpu: 0.0.40
codegen_flags: <defaults>
</compile_context>

<pallas_src>
import functools

import jax
import jax.numpy as jnp
from jax.experimental import pallas as pl
from jax.experimental.pallas import tpu as pltpu


def _ce_loss_kernel(logits_ref, target_ref, loss_ref):
    """Per-sample cross entropy with ignore_index = -1, reduction='none'.

    logits_ref: (TILE_N, C) native dtype (f32 or bf16); classes on lanes.
    target_ref: (TILE_N, 1) int32.
    loss_ref:   (TILE_N, 1) f32.
    """
    x = logits_ref[...].astype(jnp.float32)                        # (T, C)
    tgt = target_ref[...]                                          # (T, 1)

    # Numerically stable log-sum-exp over the class (lane) axis.  xm is built
    # once and reused for both the exp-reduce and the target-logit select.
    m = jnp.max(x, axis=-1, keepdims=True)                         # (T, 1)
    xm = x - m                                                     # (T, C)
    sumexp = jnp.sum(jnp.exp(xm), axis=-1, keepdims=True)          # (T, 1)

    # Gather the (shifted) target logit via a select; ignored (-1) targets are
    # clamped to class 0 and masked out below.  Labels >= C are not checked —
    # they silently select nothing (unlike PyTorch's index assert).
    class_ids = jax.lax.broadcasted_iota(jnp.int32, xm.shape, 1)   # (T, C)
    xm_t = jnp.sum(jnp.where(class_ids == jnp.maximum(tgt, 0), xm, 0.0),
                   axis=-1, keepdims=True)                         # (T, 1)

    per_sample = jnp.log(sumexp) - xm_t                            # == lse - x_t
    loss_ref[...] = jnp.where(tgt >= 0, per_sample, 0.0)


def _choose_tile_n(n, c, itemsize):
    """Pick the sample-tile height from a VMEM byte budget.

    The class axis sits on lanes and pads up to a multiple of 128 in VMEM, so
    for small C the per-row VMEM/VPU cost is lane_pad wide even though the HBM
    DMA only moves C elements.  The budget covers the double-buffered native
    input block plus ~3 f32 full-tile temporaries.
    """
    lane_pad = pl.cdiv(c, 128) * 128
    bytes_per_row = lane_pad * (2 * itemsize + 3 * 4)
    tile = (20 * 1024 * 1024) // bytes_per_row
    tile = max(128, min(int(tile), 32768))
    tile = (tile // 128) * 128
    # Keep >= 2 grid steps when possible so dimension_semantics=("parallel",)
    # can actually shard the grid across v7x's two TensorCores.
    half = max(128, pl.cdiv(pl.cdiv(n, 2), 128) * 128)
    return min(tile, half)


def _per_sample_ce(cls_pred, cls_target, tile_n=None):
    """Per-sample CE losses, shape (N,), via a 1-D-grid Pallas kernel."""
    n, c = cls_pred.shape
    if tile_n is None:
        tile_n = _choose_tile_n(n, c, jnp.dtype(cls_pred.dtype).itemsize)

    tgt = cls_target.astype(jnp.int32).reshape(n, 1)
    grid = (pl.cdiv(n, tile_n),)

    losses = pl.pallas_call(
        _ce_loss_kernel,
        out_shape=jax.ShapeDtypeStruct((n, 1), jnp.float32),
        grid=grid,
        in_specs=[
            # Logits streamed in their native dtype (bf16 halves HBM traffic);
            # C equals the full class dim so any C satisfies the (8,128) rule.
            pl.BlockSpec((tile_n, c), lambda i: (i, 0)),
            pl.BlockSpec((tile_n, 1), lambda i: (i, 0)),
        ],
        out_specs=pl.BlockSpec((tile_n, 1), lambda i: (i, 0)),
        compiler_params=pltpu.CompilerParams(
            dimension_semantics=("parallel",),
            vmem_limit_bytes=48 * 1024 * 1024,
        ),
    )(cls_pred, tgt)
    return losses[:, 0]


def _topk_sum_threshold(losses, k, num_bins):
    """Approximate sum of the k largest losses via histogram threshold selection.

    One vectorized pass of compares instead of a full sort; all values strictly
    above the selected threshold are summed exactly and the remainder is filled
    from the boundary bin's mean (tie-count correction).  Error is bounded by
    the boundary-bin width.  Intended for segmentation-scale N.
    """
    losses = losses.astype(jnp.float32)
    n = losses.shape[0]
    lo = jnp.min(losses)
    hi = jnp.max(losses)

    frac = jnp.arange(1, num_bins + 1, dtype=jnp.float32) / num_bins
    t = lo + (hi - lo) * frac
    t = t.at[-1].set(hi)                                     # nothing sits above t[-1]

    gt = losses[:, None] > t[None, :]                        # (N, B)
    cnt_gt = jnp.sum(gt, axis=0)                             # (B,) non-increasing
    sum_gt = jnp.sum(jnp.where(gt, losses[:, None], 0.0), axis=0)

    j = jnp.argmax(cnt_gt <= k)                              # first threshold with <= k above
    c_hi = cnt_gt[j]
    s_hi = sum_gt[j]
    c_prev = jnp.where(j > 0, cnt_gt[jnp.maximum(j - 1, 0)], n)
    s_prev = jnp.where(j > 0, sum_gt[jnp.maximum(j - 1, 0)], jnp.sum(losses))

    n_bin = jnp.maximum(c_prev - c_hi, 1).astype(jnp.float32)
    s_bin = s_prev - s_hi
    r = (k - c_hi).astype(jnp.float32)                       # values still needed from the bin
    return s_hi + r * s_bin / n_bin


@functools.partial(jax.jit,
                   static_argnames=("rate", "tile_n", "approx_selection", "num_bins"))
def ohem_loss(cls_pred, cls_target, rate=0.7, *, tile_n=None,
              approx_selection=False, num_bins=512):
    """Forward pass of OhemLoss(rate).

    cls_pred:   (N, C) float logits (f32 or bf16)
    cls_target: (N,)   int labels in [0, C) or -1 (ignored)
    returns:    scalar f32 loss

    Matches the PyTorch module: keep_num = min(N, int(N * rate)); ignored (-1)
    samples contribute 0 loss but still occupy selection slots and the divisor;
    keep_num == 0 yields a 0/0 NaN just like the original.
    """
    n = cls_pred.shape[0]
    per_sample = _per_sample_ce(cls_pred, cls_target, tile_n=tile_n)   # (N,)

    keep_num = min(n, int(n * rate))
    if keep_num >= n:
        kept_sum = jnp.sum(per_sample)
    elif approx_selection:
        kept_sum = _topk_sum_threshold(per_sample, keep_num, num_bins)
    else:
        kept_sum = jnp.sum(jax.lax.top_k(per_sample, keep_num)[0])
    return kept_sum / keep_num


def _reference_ohem_loss(cls_pred, cls_target, rate=0.7):
    """Pure-JAX reference for sanity checking."""
    x = cls_pred.astype(jnp.float32)
    lse = jax.nn.logsumexp(x, axis=-1)
    safe_tgt = jnp.maximum(cls_target, 0)
    x_t = jnp.take_along_axis(x, safe_tgt[:, None], axis=-1)[:, 0]
    per_sample = jnp.where(cls_target >= 0, lse - x_t, 0.0)
    n = x.shape[0]
    keep_num = min(n, int(n * rate))
    if keep_num < n:
        per_sample, _ = jax.lax.top_k(per_sample, keep_num)
    return jnp.sum(per_sample) / keep_num


if __name__ == "__main__":
    key = jax.random.PRNGKey(0)
    k_pred, k_tgt = jax.random.split(key)

    # Small shapes consistent with (batch, num_classes) logits; N=200 with
    # tile_n=128 exercises the multi-step grid AND the ragged last block.
    N, C = 200, 32
    cls_pred = jax.random.normal(k_pred, (N, C), dtype=jnp.float32)
    # labels in [-1, C): include possible ignore_index = -1 samples
    cls_target = jax.random.randint(k_tgt, (N,), -1, C, dtype=jnp.int32)

    out = jax.block_until_ready(ohem_loss(cls_pred, cls_target, rate=0.7, tile_n=128))
    ref = _reference_ohem_loss(cls_pred, cls_target, rate=0.7)
    assert jnp.allclose(out, ref, atol=1e-5, rtol=1e-5), (out, ref)

    # Auto tile selection + native bf16 streaming (halves HBM traffic); the
    # kernel still accumulates in f32.
    cls_pred_bf16 = cls_pred.astype(jnp.bfloat16)
    out_bf16 = jax.block_until_ready(ohem_loss(cls_pred_bf16, cls_target, rate=0.7))
    ref_bf16 = _reference_ohem_loss(cls_pred_bf16.astype(jnp.float32), cls_target, rate=0.7)
    assert jnp.allclose(out_bf16, ref_bf16, atol=1e-4, rtol=1e-4), (out_bf16, ref_bf16)

    # Histogram threshold selection (approximate OHEM fast path for large N).
    out_hist = jax.block_until_ready(
        ohem_loss(cls_pred, cls_target, rate=0.7, approx_selection=True))
    assert jnp.allclose(out_hist, ref, atol=1e-2, rtol=2e-2), (out_hist, ref)

    print("KERNEL_OK")
</pallas_src>

<mosaic_0001>
module attributes {stable_mosaic.version = 11 : i64} {
  func.func @_ce_loss_kernel(%arg0: i32, %arg1: memref<128x32xf32, #tpu.memory_space<vmem>>, %arg2: memref<128x1xi32, #tpu.memory_space<vmem>>, %arg3: memref<128x1xf32, #tpu.memory_space<vmem>>) attributes {dimension_semantics = [#tpu.dimension_semantics<parallel>], iteration_bounds = array<i64: 2>, scalar_prefetch = 0 : i64, scratch_operands = 0 : i64, tpu.core_type = #tpu.core_type<tc>, window_params = [{transform_indices = @transform_0, window_bounds = array<i64: 128, 32>}, {transform_indices = @transform_1, window_bounds = array<i64: 128, 1>}, {transform_indices = @transform_2, window_bounds = array<i64: 128, 1>}]} {
    %c0 = arith.constant 0 : index
    %c0_0 = arith.constant 0 : index
    %0 = vector.load %arg1[%c0, %c0_0] : memref<128x32xf32, #tpu.memory_space<vmem>>, vector<128x32xf32>
    %c0_1 = arith.constant 0 : index
    %c0_2 = arith.constant 0 : index
    %1 = vector.load %arg2[%c0_1, %c0_2] : memref<128x1xi32, #tpu.memory_space<vmem>>, vector<128x1xi32>
    %cst = arith.constant dense<0xFF800000> : vector<128xf32>
    %2 = vector.multi_reduction <maximumf>, %0, %cst [1] : vector<128x32xf32> to vector<128xf32>
    %3 = vector.shape_cast %2 : vector<128xf32> to vector<128x1xf32>
    %4 = vector.broadcast %3 : vector<128x1xf32> to vector<128x32xf32>
    %5 = arith.subf %0, %4 : vector<128x32xf32>
    %6 = math.exp %5 : vector<128x32xf32>
    %cst_3 = arith.constant dense<0.000000e+00> : vector<128xf32>
    %7 = vector.multi_reduction <add>, %6, %cst_3 [1] : vector<128x32xf32> to vector<128xf32>
    %8 = vector.shape_cast %7 : vector<128xf32> to vector<128x1xf32>
    %9 = tpu.iota {dimensions = array<i32: 1>} : vector<128x32xi32>
    %c0_i32 = arith.constant 0 : i32
    %10 = vector.broadcast %c0_i32 : i32 to vector<128x1xi32>
    %11 = arith.maxsi %1, %10 : vector<128x1xi32>
    %12 = vector.broadcast %11 : vector<128x1xi32> to vector<128x32xi32>
    %13 = arith.cmpi eq, %9, %12 : vector<128x32xi32>
    %cst_4 = arith.constant 0.000000e+00 : f32
    %14 = vector.broadcast %cst_4 : f32 to vector<128x32xf32>
    %15 = arith.select %13, %5, %14 : vector<128x32xi1>, vector<128x32xf32>
    %cst_5 = arith.constant dense<0.000000e+00> : vector<128xf32>
    %16 = vector.multi_reduction <add>, %15, %cst_5 [1] : vector<128x32xf32> to vector<128xf32>
    %17 = vector.shape_cast %16 : vector<128xf32> to vector<128x1xf32>
    %18 = math.log %8 : vector<128x1xf32>
    %19 = arith.subf %18, %17 : vector<128x1xf32>
    %c0_i32_6 = arith.constant 0 : i32
    %20 = vector.broadcast %c0_i32_6 : i32 to vector<128x1xi32>
    %21 = arith.cmpi sge, %1, %20 : vector<128x1xi32>
    %cst_7 = arith.constant 0.000000e+00 : f32
    %22 = vector.broadcast %cst_7 : f32 to vector<128x1xf32>
    %23 = arith.select %21, %19, %22 : vector<128x1xi1>, vector<128x1xf32>
    %c0_8 = arith.constant 0 : index
    %c0_9 = arith.constant 0 : index
    %24 = vector.load %arg3[%c0_8, %c0_9] : memref<128x1xf32, #tpu.memory_space<vmem>>, vector<128x1xf32>
    tpu.vector_store %arg3[%c0_8, %c0_9], %23 {strides = array<i32>} : memref<128x1xf32, #tpu.memory_space<vmem>>, vector<128x1xf32>,
    return
  }
  func.func @transform_0(%arg0: i32) -> (i32, i32) {
    %c0_i32 = arith.constant 0 : i32
    %c0_i32_0 = arith.constant 0 : i32
    return %arg0, %c0_i32 : i32, i32
  }
  func.func @transform_1(%arg0: i32) -> (i32, i32) {
    %c0_i32 = arith.constant 0 : i32
    %c0_i32_0 = arith.constant 0 : i32
    return %arg0, %c0_i32 : i32, i32
  }
  func.func @transform_2(%arg0: i32) -> (i32, i32) {
    %c0_i32 = arith.constant 0 : i32
    %c0_i32_0 = arith.constant 0 : i32
    return %arg0, %c0_i32 : i32, i32
  }
}

</mosaic_0001>

<bundles_post_ra>
// kernel: ohem_loss.1
= control target key start
LH: loop header
LB: loop body
LE: loop exit
PB: predicated region body
PF: predicated region fallthrough
CT: control target
= control target key end

     0   :  { %s1218_s9 = smov 0   ;;  %s1220_s10 = smov 0   ;;  %s1711_s0 = inlined_call_operand.vmem [shape: f32[200,32], index: 0, kind: input, shape index: {}]   ;;  %s1712_s1 = inlined_call_operand.vmem [shape: s32[200,1], index: 1, kind: input, shape index: {}]   ;;  %s1713_s2 = inlined_call_operand.vmem [shape: f32[200,1], index: 2, kind: output, shape index: {}]  }
   0x1   :  { %s1222_s11 = smov 0  }
   0x2 LB: > { %s1231_s12 = sadd.s32 4294967295, %s1168_s11   ;;  %s1233_s13 = sadd.s32 1, %s1168_s11   ;;  %s1168_s11 = sphi %s1222_s11, %s1720_s11   ;;  %s1164_s10 = sphi %s1220_s10, %s1719_s10   ;;  %s1160_s9 = sphi %s1218_s9, %s1718_s9  }
   0x3   : > { %s68_s14 = ssub.s32 %s1168_s11, %s1233_s13  ;;  %s71_s15 = sadd.s32 1, %s1164_s10 }
   0x4   : > { %p69_p0 = scmp.eq.s32.totalorder %s68_s14, 0  ;;  %p81_p1 = scmp.ne.s32.totalorder %s1164_s10, %s1160_s9 }
   0x5   : > { %p82_p2 = scmp.eq.s32.totalorder %s1231_s12, 1  ;;  %p933_p3 = scmp.ge.s32.totalorder %s1168_s11, 1 }
   0x6   : > { %s1241_s16 = scalar_select %p69_p0, %s1164_s10, %s71_s15  }
   0x7   : > { %p1243_p4 = por %p82_p2, %p81_p1  ;;  %p140_p5 = scmp.lt.s32.totalorder %s1168_s11, 3 }
   0x9   : > { %p141_p6 = pnand %p933_p3, %p140_p5 }
   0xa   : > { %s1248_s18 = sshll.u32 (!%p141_p6), %s1231_s12, 4  ;;  %v1202_v0 = vmov (!%p141_p6), 0   ;;  %vm239_vm0 = vcmask (!%p141_p6), 261120   ;;  %s171_s27 = sand.u32 (!%p141_p6), 1, %s1160_s9  }
   0xb   : > { %144 = sbr.rel (%p141_p6) target bundleno = 469 (0x1d5), region = 28  ;;  %p179_p7 = scmp.lt.s32.totalorder (!%p141_p6), %s1248_s18, 24  ;;  %1048 = vset.pattern.permute.xlu1 (!%p141_p6), %v1202_v0  ;;  %1049 = vset.pattern.permute.xlu0 (!%p141_p6), %v1202_v0 }
   0xc   : > { %s934_s28 = sshll.u32 (!%p141_p6), %s171_s27, 7 }
   0xd   : > { %s1559_s29 = scalar_lea.vmem (!%p141_p6), [#allocation2], %s934_s28  }
  0x12   : > { %s1252_s19 = scalar_select %p179_p7, %s1248_s18, 24 }
  0x13   : > { %s651_s30 = ssub.s32 (%p1243_p4), 25, %s1248_s18  ;;  %s956_s3 = sshll.u32 (%p1243_p4), %s1231_s12, 7 }
  0x14   : > { %s936_s20 = sshll.u32 %s1252_s19, 3  ;;  %p652_p8 = scmp.lt.s32.totalorder (%p1243_p4), %s651_s30, 16 }
  0x15   : > { %s1260_s23 = scalar_lea.vmem %s1711_s0, %s936_s20  ;;  %s1347_s26 = scalar_lea.vmem %s1712_s1, %s936_s20 }
  0x16   : > { %v1263_v1 = vld [vmem:[%s1260_s23 + $0x10] sm:$0xff]  ;;  %v1266_v2 = vld [vmem:[%s1260_s23] sm:$0xff]  ;;  %v1269_v3 = vld [vmem:[%s1260_s23 + $0x18] sm:$0xff]  ;;  %s1618_s6 = scalar_lea.vmem (%p1243_p4), %s1713_s2, %s956_s3  }
  0x17   : > { %v246_v4 = vsel %vm239_vm0, %v1263_v1, -inf  ;;  %v240_v5 = vsel %vm239_vm0, %v1266_v2, -inf  ;;  %v1276_v6 = vld [vmem:[%s1260_s23 + $0x8] sm:$0xff]  ;;  %v249_v7 = vsel %vm239_vm0, %v1269_v3, -inf  ;;  %v1286_v10 = vld [vmem:[%s1260_s23 + $0x20] sm:$0xff]  ;;  %v1293_v13 = vld [vmem:[%s1260_s23 + $0x38] sm:$0xff] }
  0x18   : > { %247 = vmax.xlane.f32.xlu1 %v246_v4  ;;  %241 = vmax.xlane.f32.xlu0 %v240_v5  ;;  %v243_v8 = vsel %vm239_vm0, %v1276_v6, -inf  ;;  %v1283_v9 = vld [vmem:[%s1260_s23 + $0x28] sm:$0xff]  ;;  %v252_v12 = vsel %vm239_vm0, %v1286_v10, -inf  ;;  %v1296_v14 = vld [vmem:[%s1260_s23 + $0x30] sm:$0xff]  ;;  %v261_v15 = vsel %vm239_vm0, %v1293_v13, -inf  ;;  %v1306_v18 = vld [vmem:[%s1260_s23 + $0x40] sm:$0xff] }
  0x19   : > { %v255_v11 = vsel %vm239_vm0, %v1283_v9, -inf  ;;  %v258_v16 = vsel %vm239_vm0, %v1296_v14, -inf  ;;  %v1303_v17 = vld [vmem:[%s1260_s23 + $0x48] sm:$0xff]  ;;  %v264_v20 = vsel %vm239_vm0, %v1306_v18, -inf  ;;  %v1313_v21 = vld [vmem:[%s1260_s23 + $0x58] sm:$0xff]  ;;  %v1316_v22 = vld [vmem:[%s1260_s23 + $0x50] sm:$0xff] }
  0x1a   : > { %v267_v19 = vsel %vm239_vm0, %v1303_v17, -inf  ;;  %v273_v23 = vsel %vm239_vm0, %v1313_v21, -inf  ;;  %v270_v24 = vsel %vm239_vm0, %v1316_v22, -inf  ;;  %v1323_v25 = vld [vmem:[%s1260_s23 + $0x68] sm:$0xff]  ;;  %v1326_v26 = vld [vmem:[%s1260_s23 + $0x60] sm:$0xff]  ;;  %v1333_v29 = vld [vmem:[%s1260_s23 + $0x78] sm:$0xff] }
  0x1b   : > { %v279_v27 = vsel %vm239_vm0, %v1323_v25, -inf  ;;  %v276_v28 = vsel %vm239_vm0, %v1326_v26, -inf  ;;  %v1336_v30 = vld [vmem:[%s1260_s23 + $0x70] sm:$0xff]  ;;  %v285_v31 = vsel %vm239_vm0, %v1333_v29, -inf  ;;  %v1350_v33 = vld [vmem:[%s1347_s26] sm:$0xff]  ;;  %v1357_v35 = vld [vmem:[%s1347_s26 + $0x8] sm:$0xff] }
  0x1c   : > { %250 = vmax.xlane.f32.xlu1 %v249_v7  ;;  %244 = vmax.xlane.f32.xlu0 %v243_v8  ;;  %v282_v32 = vsel %vm239_vm0, %v1336_v30, -inf  ;;  %vm386_vm1 = vcmp.gt.s32.totalorder %v1350_v33, 0  ;;  %v1354_v34 = vld [vmem:[%s1347_s26 + $0x10] sm:$0xff]  ;;  %vm388_vm3 = vcmp.gt.s32.totalorder %v1357_v35, 0  ;;  %v1363_v37 = vld [vmem:[%s1347_s26 + $0x18] sm:$0xff]  ;;  %v1373_v41 = vld [vmem:[%s1347_s26 + $0x20] sm:$0xff] }
  0x1d   : > { %v387_v36 = vsel %vm386_vm1, %v1350_v33, 0  ;;  %vm390_vm2 = vcmp.gt.s32.totalorder %v1354_v34, 0  ;;  %v1366_v38 = vld [vmem:[%s1347_s26 + $0x50] sm:$0xff]  ;;  %v389_v40 = vsel %vm388_vm3, %v1357_v35, 0  ;;  %vm392_vm4 = vcmp.gt.s32.totalorder %v1363_v37, 0  ;;  %v1376_v42 = vld [vmem:[%s1347_s26 + $0x60] sm:$0xff] }
  0x1e   : > { %v391_v39 = vsel %vm390_vm2, %v1354_v34, 0  ;;  %vm406_vm5 = vcmp.gt.s32.totalorder %v1366_v38, 0  ;;  %v393_v43 = vsel %vm392_vm4, %v1363_v37, 0  ;;  %vm394_vm6 = vcmp.gt.s32.totalorder %v1373_v41, 0  ;;  %v1383_v45 = vld [vmem:[%s1347_s26 + $0x28] sm:$0xff]  ;;  %v1386_v46 = vld [vmem:[%s1347_s26 + $0x70] sm:$0xff] }
  0x1f   : > { %v407_v44 = vsel %vm406_vm5, %v1366_v38, 0  ;;  %vm410_vm7 = vcmp.gt.s32.totalorder %v1376_v42, 0  ;;  %v395_v47 = vsel %vm394_vm6, %v1373_v41, 0  ;;  %vm396_vm8 = vcmp.gt.s32.totalorder %v1383_v45, 0  ;;  %v1393_v49 = vld [vmem:[%s1347_s26 + $0x30] sm:$0xff]  ;;  %v1399_v52 = vld [vmem:[%s1347_s26 + $0x38] sm:$0xff] }
  0x20   : > { %256 = vmax.xlane.f32.xlu1 %v255_v11  ;;  %253 = vmax.xlane.f32.xlu0 %v252_v12  ;;  %v411_v48 = vsel %vm410_vm7, %v1376_v42, 0  ;;  %vm414_vm9 = vcmp.gt.s32.totalorder %v1386_v46, 0  ;;  %v397_v50 = vsel %vm396_vm8, %v1383_v45, 0  ;;  %vm398_vm10 = vcmp.gt.s32.totalorder %v1393_v49, 0  ;;  %v1404_v54 = vld [vmem:[%s1347_s26 + $0x40] sm:$0xff]  ;;  %v1409_v56 = vld [vmem:[%s1347_s26 + $0x48] sm:$0xff] }
  0x21   : > { %v415_v51 = vsel %vm414_vm9, %v1386_v46, 0  ;;  %v399_v53 = vsel %vm398_vm10, %v1393_v49, 0  ;;  %vm400_vm11 = vcmp.gt.s32.totalorder %v1399_v52, 0  ;;  %vm402_vm12 = vcmp.gt.s32.totalorder %v1404_v54, 0  ;;  %v1414_v58 = vld [vmem:[%s1347_s26 + $0x58] sm:$0xff]  ;;  %v1419_v60 = vld [vmem:[%s1347_s26 + $0x68] sm:$0xff] }
  0x22   : > { %v401_v55 = vsel %vm400_vm11, %v1399_v52, 0  ;;  %v403_v57 = vsel %vm402_vm12, %v1404_v54, 0  ;;  %vm404_vm13 = vcmp.gt.s32.totalorder %v1409_v56, 0  ;;  %vm408_vm14 = vcmp.gt.s32.totalorder %v1414_v58, 0  ;;  %v1424_v62 = vld [vmem:[%s1347_s26 + $0x78] sm:$0xff] }
  0x23   : > { %v405_v59 = vsel %vm404_vm13, %v1409_v56, 0  ;;  %v409_v61 = vsel %vm408_vm14, %v1414_v58, 0  ;;  %vm412_vm15 = vcmp.gt.s32.totalorder %v1419_v60, 0  ;;  %vm416_vm1 = vcmp.gt.s32.totalorder %v1424_v62, 0 }
  0x24   : > { %262 = vmax.xlane.f32.xlu1 %v261_v15  ;;  %259 = vmax.xlane.f32.xlu0 %v258_v16  ;;  %v413_v63 = vsel %vm412_vm15, %v1419_v60, 0  ;;  %v417_v0 = vsel %vm416_vm1, %v1424_v62, 0 }
  0x28   : > { %268 = vmax.xlane.f32.xlu1 %v267_v19  ;;  %265 = vmax.xlane.f32.xlu0 %v264_v20 }
  0x2c   : > { %274 = vmax.xlane.f32.xlu1 %v273_v23  ;;  %271 = vmax.xlane.f32.xlu0 %v270_v24 }
  0x30   : > { %280 = vmax.xlane.f32.xlu1 %v279_v27  ;;  %277 = vmax.xlane.f32.xlu0 %v276_v28 }
  0x34   : > { %286 = vmax.xlane.f32.xlu1 %v285_v31  ;;  %283 = vmax.xlane.f32.xlu0 %v282_v32  ;;  %v384_v31 = vlaneseq }
  0x45   : > { %419 = vperm.xlu1 %1048, %v387_v36   ;;  %v1441_v36 = vand.u32 127, %v384_v31 }
  0x49   : > { %425 = vperm.xlu1 %1048, %v391_v39  }
  0x4a   : > { %422 = vperm.xlu0 %1049, %v389_v40  }
  0x4d   : > { %428 = vperm.xlu1 %1048, %v393_v43  }
  0x4e   : > { %449 = vperm.xlu0 %1049, %v407_v44  }
  0x51   : > { %431 = vperm.xlu1 %1048, %v395_v47  }
  0x52   : > { %455 = vperm.xlu0 %1049, %v411_v48  }
  0x55   : > { %434 = vperm.xlu1 %1048, %v397_v50  }
  0x56   : > { %461 = vperm.xlu0 %1049, %v415_v51  }
  0x59   : > { %437 = vperm.xlu1 %1048, %v399_v53  }
  0x5d   : > { %440 = vperm.xlu1 %1048, %v401_v55  }
  0x61   : > { %443 = vperm.xlu1 %1048, %v403_v57  }
  0x65   : > { %446 = vperm.xlu1 %1048, %v405_v59  }
  0x69   : > { %452 = vperm.xlu1 %1048, %v409_v61  }
  0x6d   : > { %458 = vperm.xlu1 %1048, %v413_v63  }
  0x71   : > { %464 = vperm.xlu1 %1048, %v417_v0  }
  0xa5   : > { %v248_v4 = vpop.xlane.xlu1 %247  ;;  %v242_v5 = vpop.xlane.xlu0 %241 }
  0xa6   : > { %v288_v40 = vsub.f32 %v1266_v2, %v242_v5  ;;  %v290_v48 = vsub.f32 %v1263_v1, %v248_v4 }
  0xa8   : > { %v304_v1 = vmul.f32 1.442695, %v288_v40 }
  0xa9   : > { %v251_v7 = vpop.xlane.xlu1 %250  ;;  %v245_v8 = vpop.xlane.xlu0 %244 }
  0xaa   : > { %v289_v50 = vsub.f32 %v1276_v6, %v245_v8  ;;  %v291_v61 = vsub.f32 %v1269_v3, %v251_v7  ;;  %v308_v8 = vmul.f32 1.442695, %v290_v48  ;;  %1050 = vpow2.f32 %v304_v1 }
  0xac   : > { %v306_v31 = vmul.f32 1.442695, %v289_v50  ;;  %1052 = vpow2.f32 %v308_v8 }
  0xad   : > { %v257_v11 = vpop.xlane.xlu1 %256  ;;  %v254_v12 = vpop.xlane.xlu0 %253 }
  0xae   : > { %v292_v4 = vsub.f32 %v1286_v10, %v254_v12  ;;  %v293_v7 = vsub.f32 %v1283_v9, %v257_v11  ;;  %1054 = vpow2.f32 %v306_v31 }
  0xb0   : > { %v312_v10 = vmul.f32 1.442695, %v292_v4 }
  0xb1   : > { %v263_v15 = vpop.xlane.xlu1 %262  ;;  %v260_v16 = vpop.xlane.xlu0 %259 }
  0xb2   : > { %v294_v12 = vsub.f32 %v1296_v14, %v260_v16 }
  0xb4   : > { %v316_v9 = vmul.f32 1.442695, %v294_v12  ;;  %v1051_v14 = vpop.eup %1050 }
  0xb5   : > { %v1429_v19 = vpop.xlane.xlu1 %268  ;;  %v266_v20 = vpop.xlane.xlu0 %265 }
  0xb6   : > { %v1467_v11 = vsub.f32 %v1306_v18, %v266_v20  ;;  %v1053_v20 = vpop.eup %1052 }
  0xb8   : > { %v1055_v1 = vpop.eup %1054 }
  0xb9   : > { %v1431_v23 = vpop.xlane.xlu1 %274  ;;  %v1433_v24 = vpop.xlane.xlu0 %271 }
  0xba   : > { %v1478_v18 = vsub.f32 %v1316_v22, %v1433_v24 }
  0xbc   : > { %v324_v24 = vmul.f32 1.442695, %v1478_v18 }
  0xbd   : > { %v1435_v27 = vpop.xlane.xlu1 %280  ;;  %v1437_v28 = vpop.xlane.xlu0 %277 }
  0xbe   : > { %v1489_v22 = vsub.f32 %v1323_v25, %v1435_v27 }
  0xc0   : > { %v330_v25 = vmul.f32 1.442695, %v1489_v22 }
  0xc1   : > { %v1439_v32 = vpop.xlane.xlu1 %286  ;;  %v1443_v39 = vpop.xlane.xlu0 %283 }
  0xc5   : > { %v420_v43 = vpop.permute.xlu1 %419 }
  0xc6   : > { %vm466_vm2 = vcmp.eq.s32.totalorder %v1441_v36, %v420_v43 }
  0xc7   : > { %v482_v44 = vsel %vm466_vm2, %v288_v40, 0.0  ;;  %v310_v40 = vmul.f32 1.442695, %v291_v61 }
  0xc8   : > { %v498_v47 = vsel %vm239_vm0, %v482_v44, 0.0 }
  0xc9   : > { %v426_v51 = vpop.permute.xlu1 %425  ;;  %499 = vadd.xlane.f32.xlu0 %v498_v47  ;;  %v423_v53 = vpop.permute.xlu0 %422  ;;  %1056 = vpow2.f32 %v310_v40 }
  0xca   : > { %vm468_vm3 = vcmp.eq.s32.totalorder %v1441_v36, %v426_v51  ;;  %vm467_vm4 = vcmp.eq.s32.totalorder %v1441_v36, %v423_v53  ;;  %v295_v53 = vsub.f32 %v1293_v13, %v263_v15  ;;  %1058 = vpow2.f32 %v312_v10 }
  0xcb   : > { %v484_v55 = vsel %vm468_vm3, %v290_v48, 0.0  ;;  %v483_v57 = vsel %vm467_vm4, %v289_v50, 0.0  ;;  %v314_v50 = vmul.f32 1.442695, %v293_v7  ;;  %v320_v13 = vmul.f32 1.442695, %v1467_v11 }
  0xcc   : > { %v504_v2 = vsel %vm239_vm0, %v484_v55, 0.0  ;;  %v501_v59 = vsel %vm239_vm0, %v483_v57, 0.0  ;;  %vm626_vm3 = vcmask 7168   ;;  %vm595_vm4 = vcmp.ge.s32.totalorder %v1357_v35, 0 }
  0xcd   : > { %v429_v63 = vpop.permute.xlu1 %428  ;;  %505 = vadd.xlane.f32.xlu0 %v504_v2  ;;  %502 = vadd.xlane.f32.xlu1 %v501_v59  ;;  %1060 = vpow2.f32 %v314_v50  ;;  %v318_v2 = vmul.f32 1.442695, %v295_v53  ;;  %v1472_v59 = vsub.f32 %v1303_v17, %v1429_v19  ;;  %v1485_v19 = vsub.f32 %v1313_v21, %v1431_v23 }
  0xce   : > { %vm469_vm5 = vcmp.eq.s32.totalorder %v1441_v36, %v429_v63  ;;  %1062 = vpow2.f32 %v316_v9  ;;  %v1497_v21 = vsub.f32 %v1326_v26, %v1437_v28  ;;  %v1502_v23 = vsub.f32 %v1333_v29, %v1439_v32 }
  0xcf   : > { %v485_v6 = vsel %vm469_vm5, %v291_v61, 0.0  ;;  %v336_v61 = vsel %vm239_vm0, %v1051_v14, 0.0  ;;  %1064 = vpow2.f32 %v318_v2  ;;  %v322_v17 = vmul.f32 1.442695, %v1472_v59 }
  0xd0   : > { %v507_v0 = vsel %vm239_vm0, %v485_v6, 0.0  ;;  %1066 = vpow2.f32 %v320_v13  ;;  %v326_v8 = vmul.f32 1.442695, %v1485_v19  ;;  %v334_v26 = vmul.f32 1.442695, %v1502_v23 }
  0xd1   : > { %v432_v5 = vpop.permute.xlu1 %431  ;;  %508 = vadd.xlane.f32.xlu1 %v507_v0  ;;  %v342_v0 = vsel %vm239_vm0, %v1053_v20, 0.0  ;;  %1068 = vpow2.f32 %v322_v17  ;;  %v1510_v28 = vsub.f32 %v1336_v30, %v1443_v39  ;;  %vm596_vm5 = vcmp.ge.s32.totalorder %v1354_v34, 0 }
  0xd2   : > { %vm470_vm6 = vcmp.eq.s32.totalorder %v1441_v36, %v432_v5  ;;  %1070 = vpow2.f32 %v324_v24 }
  0xd3   : > { %v486_v43 = vsel %vm470_vm6, %v292_v4, 0.0  ;;  %v1057_v6 = vpop.eup %1056  ;;  %v339_v4 = vsel %vm239_vm0, %v1055_v1, 0.0  ;;  %1072 = vpow2.f32 %v326_v8  ;;  %vm597_vm6 = vcmp.ge.s32.totalorder %v1363_v37, 0 }
  0xd4   : > { %v510_v3 = vsel %vm239_vm0, %v486_v43, 0.0  ;;  %v1059_v5 = vpop.eup %1058  ;;  %v345_v43 = vsel %vm239_vm0, %v1057_v6, 0.0  ;;  %1074 = vpow2.f32 %v330_v25 }
  0xd5   : > { %v435_v44 = vpop.permute.xlu1 %434  ;;  %511 = vadd.xlane.f32.xlu0 %v510_v3  ;;  %v348_v31 = vsel %vm239_vm0, %v1059_v5, 0.0 }
  0xd6   : > { %vm471_vm7 = vcmp.eq.s32.totalorder %v1441_v36, %v435_v44 }
  0xd7   : > { %v487_v47 = vsel %vm471_vm7, %v293_v7, 0.0  ;;  %v1061_v27 = vpop.eup %1060  ;;  %v328_v7 = vmul.f32 1.442695, %v1497_v21  ;;  %vm598_vm7 = vcmp.ge.s32.totalorder %v1373_v41, 0 }
  0xd8   : > { %v513_v48 = vsel %vm239_vm0, %v487_v47, 0.0  ;;  %v1063_v3 = vpop.eup %1062  ;;  %v351_v40 = vsel %vm239_vm0, %v1061_v27, 0.0 }
  0xd9   : > { %v438_v51 = vpop.permute.xlu1 %437  ;;  %514 = vadd.xlane.f32.xlu1 %v513_v48  ;;  %v1065_v32 = vpop.eup %1064  ;;  %v354_v44 = vsel %vm239_vm0, %v1063_v3, 0.0  ;;  %1076 = vpow2.f32 %v328_v7 }
  0xda   : > { %vm472_vm8 = vcmp.eq.s32.totalorder %v1441_v36, %v438_v51  ;;  %v1067_v10 = vpop.eup %1066  ;;  %1078 = vpow2.f32 %v334_v26  ;;  %v357_v51 = vsel %vm239_vm0, %v1065_v32, 0.0 }
  0xdb   : > { %v488_v55 = vsel %vm472_vm8, %v294_v12, 0.0  ;;  %v332_v12 = vmul.f32 1.442695, %v1510_v28  ;;  %v1069_v47 = vpop.eup %1068  ;;  %v360_v48 = vsel %vm239_vm0, %v1067_v10, 0.0  ;;  %vm599_vm8 = vcmp.ge.s32.totalorder %v1383_v45, 0 }
  0xdc   : > { %v516_v57 = vsel %vm239_vm0, %v488_v55, 0.0  ;;  %v1071_v30 = vpop.eup %1070 }
  0xdd   : > { %v441_v16 = vpop.permute.xlu1 %440  ;;  %517 = vadd.xlane.f32.xlu0 %v516_v57  ;;  %1080 = vpow2.f32 %v332_v12  ;;  %v1073_v50 = vpop.eup %1072  ;;  %v366_v9 = vsel %vm239_vm0, %v1071_v30, 0.0 }
  0xde   : > { %vm473_vm9 = vcmp.eq.s32.totalorder %v1441_v36, %v441_v16  ;;  %v1075_v55 = vpop.eup %1074  ;;  %v369_v16 = vsel %vm239_vm0, %v1073_v50, 0.0 }
  0xdf   : > { %v489_v15 = vsel %vm473_vm9, %v295_v53, 0.0  ;;  %v363_v53 = vsel %vm239_vm0, %v1069_v47, 0.0  ;;  %v375_v2 = vsel %vm239_vm0, %v1075_v55, 0.0  ;;  %vm600_vm9 = vcmp.ge.s32.totalorder %v1393_v49, 0 }
  0xe0   : > { %v519_v63 = vsel %vm239_vm0, %v489_v15, 0.0  ;;  %v450_v15 = vpop.permute.xlu0 %449 }
  0xe1   : > { %337 = vadd.xlane.f32.xlu0 %v336_v61  ;;  %520 = vadd.xlane.f32.xlu1 %v519_v63  ;;  %v444_v29 = vpop.permute.xlu1 %443  ;;  %vm476_vm13 = vcmp.eq.s32.totalorder %v1441_v36, %v450_v15 }
  0xe2   : > { %vm474_vm11 = vcmp.eq.s32.totalorder %v1441_v36, %v444_v29 }
  0xe3   : > { %v1077_v14 = vpop.eup %1076 }
  0xe4   : > { %v1079_v13 = vpop.eup %1078  ;;  %v372_v20 = vsel %vm239_vm0, %v1077_v14, 0.0 }
  0xe5   : > { %343 = vadd.xlane.f32.xlu0 %v342_v0  ;;  %340 = vadd.xlane.f32.xlu1 %v339_v4  ;;  %v447_v39 = vpop.permute.xlu1 %446  ;;  %v381_v61 = vsel %vm239_vm0, %v1079_v13, 0.0  ;;  %v456_v0 = vpop.permute.xlu0 %455  ;;  %v490_v4 = vsel %vm474_vm11, %v1467_v11, 0.0  ;;  %vm603_vm11 = vcmp.ge.s32.totalorder %v1409_v56, 0 }
  0xe6   : > { %vm475_vm10 = vcmp.eq.s32.totalorder %v1441_v36, %v447_v39  ;;  %v522_v8 = vsel %vm239_vm0, %v490_v4, 0.0  ;;  %vm478_vm15 = vcmp.eq.s32.totalorder %v1441_v36, %v456_v0 }
  0xe7   : > { %v1081_v63 = vpop.eup %1080  ;;  %v491_v17 = vsel %vm475_vm10, %v1472_v59, 0.0  ;;  %v494_v7 = vsel %vm478_vm15, %v1497_v21, 0.0  ;;  %vm601_vm10 = vcmp.ge.s32.totalorder %v1399_v52, 0  ;;  %vm604_vm15 = vcmp.ge.s32.totalorder %v1366_v38, 0 }
  0xe8   : > { %v378_v24 = vsel %vm239_vm0, %v1081_v63, 0.0  ;;  %v525_v6 = vsel %vm239_vm0, %v491_v17, 0.0 }
  0xe9   : > { %349 = vadd.xlane.f32.xlu0 %v348_v31  ;;  %346 = vadd.xlane.f32.xlu1 %v345_v43  ;;  %v453_v57 = vpop.permute.xlu1 %452  ;;  %v492_v31 = vsel %vm476_vm13, %v1478_v18, 0.0  ;;  %v462_v11 = vpop.permute.xlu0 %461  ;;  %v534_v18 = vsel %vm239_vm0, %v494_v7, 0.0  ;;  %vm605_vm13 = vcmp.ge.s32.totalorder %v1414_v58, 0 }
  0xea   : > { %vm477_vm12 = vcmp.eq.s32.totalorder %v1441_v36, %v453_v57  ;;  %v528_v43 = vsel %vm239_vm0, %v492_v31, 0.0  ;;  %vm480_vm2 = vcmp.eq.s32.totalorder %v1441_v36, %v462_v11 }
  0xeb   : > { %v493_v5 = vsel %vm477_vm12, %v1485_v19, 0.0  ;;  %v496_v26 = vsel %vm480_vm2, %v1510_v28, 0.0  ;;  %vm602_vm12 = vcmp.ge.s32.totalorder %v1404_v54, 0  ;;  %vm606_vm2 = vcmp.ge.s32.totalorder %v1376_v42, 0 }
  0xec   : > { %v531_v25 = vsel %vm239_vm0, %v493_v5, 0.0  ;;  %v540_v29 = vsel %vm239_vm0, %v496_v26, 0.0 }
  0xed   : > { %355 = vadd.xlane.f32.xlu0 %v354_v44  ;;  %352 = vadd.xlane.f32.xlu1 %v351_v40  ;;  %v459_v1 = vpop.permute.xlu1 %458 }
  0xee   : > { %vm479_vm14 = vcmp.eq.s32.totalorder %v1441_v36, %v459_v1 }
  0xef   : > { %v495_v27 = vsel %vm479_vm14, %v1489_v22, 0.0  ;;  %vm607_vm14 = vcmp.ge.s32.totalorder %v1419_v60, 0 }
  0xf0   : > { %v537_v19 = vsel %vm239_vm0, %v495_v27, 0.0 }
  0xf1   : > { %361 = vadd.xlane.f32.xlu0 %v360_v48  ;;  %358 = vadd.xlane.f32.xlu1 %v357_v51  ;;  %v465_v59 = vpop.permute.xlu1 %464 }
  0xf2   : > { %vm481_vm1 = vcmp.eq.s32.totalorder %v1441_v36, %v465_v59 }
  0xf3   : > { %v497_v3 = vsel %vm481_vm1, %v1502_v23, 0.0  ;;  %vm609_vm1 = vcmp.ge.s32.totalorder %v1424_v62, 0 }
  0xf4   : > { %v543_v22 = vsel %vm239_vm0, %v497_v3, 0.0  ;;  %vm594_vm0 = vcmp.ge.s32.totalorder %v1350_v33, 0 }
  0xf5   : > { %364 = vadd.xlane.f32.xlu0 %v363_v53  ;;  %367 = vadd.xlane.f32.xlu1 %v366_v9 }
  0xf9   : > { %370 = vadd.xlane.f32.xlu0 %v369_v16  ;;  %376 = vadd.xlane.f32.xlu1 %v375_v2 }
  0xfd   : > { %373 = vadd.xlane.f32.xlu0 %v372_v20  ;;  %382 = vadd.xlane.f32.xlu1 %v381_v61 }
 0x101   : > { %379 = vadd.xlane.f32.xlu0 %v378_v24  ;;  %526 = vadd.xlane.f32.xlu1 %v525_v6 }
 0x105   : > { %523 = vadd.xlane.f32.xlu0 %v522_v8  ;;  %532 = vadd.xlane.f32.xlu1 %v531_v25 }
 0x109   : > { %538 = vadd.xlane.f32.xlu1 %v537_v19  ;;  %529 = vadd.xlane.f32.xlu0 %v528_v43 }
 0x10d   : > { %544 = vadd.xlane.f32.xlu1 %v543_v22  ;;  %535 = vadd.xlane.f32.xlu0 %v534_v18 }
 0x111   : > { %541 = vadd.xlane.f32.xlu0 %v540_v29 }
 0x156   : > { %v500_v32 = vpop.xlane.xlu0 %499 }
 0x15a   : > { %v503_v44 = vpop.xlane.xlu1 %502  ;;  %v506_v40 = vpop.xlane.xlu0 %505 }
 0x15e   : > { %v509_v23 = vpop.xlane.xlu1 %508 }
 0x162   : > { %v1548_v10 = vpop.xlane.xlu0 %511 }
 0x166   : > { %v1550_v21 = vpop.xlane.xlu1 %514 }
 0x16a   : > { %v1552_v36 = vpop.xlane.xlu0 %517 }
 0x16e   : > { %v1554_v12 = vpop.xlane.xlu1 %520  ;;  %v338_v47 = vpop.xlane.xlu0 %337 }
 0x16f   : > { %1082 = vlog2.f32 %v338_v47 }
 0x172   : > { %v341_v48 = vpop.xlane.xlu1 %340  ;;  %v344_v28 = vpop.xlane.xlu0 %343 }
 0x173   : > { %1084 = vlog2.f32 %v341_v48 }
 0x174   : > { %1086 = vlog2.f32 %v344_v28 }
 0x176   : > { %v347_v51 = vpop.xlane.xlu1 %346  ;;  %v350_v30 = vpop.xlane.xlu0 %349 }
 0x177   : > { %1088 = vlog2.f32 %v347_v51 }
 0x178   : > { %1090 = vlog2.f32 %v350_v30 }
 0x179   : > { %v1083_v39 = vpop.eup %1082 }
 0x17a   : > { %v547_v50 = vmul.f32 0.6931472, %v1083_v39  ;;  %v353_v53 = vpop.xlane.xlu1 %352  ;;  %v356_v9 = vpop.xlane.xlu0 %355 }
 0x17b   : > { %1092 = vlog2.f32 %v353_v53 }
 0x17c   : > { %v578_v55 = vsub.f32 %v547_v50, %v500_v32  ;;  %1094 = vlog2.f32 %v356_v9 }
 0x17d   : > { %v1085_v57 = vpop.eup %1084 }
 0x17e   : > { %v1087_v14 = vpop.eup %1086  ;;  %v610_v16 = vsel %vm594_vm0, %v578_v55, 0.0  ;;  %v549_v2 = vmul.f32 0.6931472, %v1085_v57  ;;  %v359_v13 = vpop.xlane.xlu1 %358  ;;  %vm608_vm0 = vcmp.ge.s32.totalorder %v1386_v46, 0 }
 0x17f   : > { %v362_v15 = vpop.xlane.xlu0 %361  ;;  %627 = vst.msk [vmem:[%s1559_s29] sm:$0xff] %vm626_vm3, %v610_v16  ;;  %v551_v20 = vmul.f32 0.6931472, %v1087_v14  ;;  %1096 = vlog2.f32 %v359_v13 }
 0x180   : > { %v579_v33 = vsub.f32 %v549_v2, %v503_v44  ;;  %1098 = vlog2.f32 %v362_v15 }
 0x181   : > { %v1089_v61 = vpop.eup %1088  ;;  %v580_v63 = vsub.f32 %v551_v20, %v506_v40 }
 0x182   : > { %v1091_v1 = vpop.eup %1090  ;;  %v611_v17 = vsel %vm595_vm4, %v579_v33, 0.0  ;;  %v553_v24 = vmul.f32 0.6931472, %v1089_v61  ;;  %v368_v6 = vpop.xlane.xlu1 %367 }
 0x183   : > { %v365_v0 = vpop.xlane.xlu0 %364  ;;  %628 = vst.msk [vmem:[%s1559_s29 + $0x8] sm:$0xff] %vm626_vm3, %v611_v17  ;;  %v612_v35 = vsel %vm596_vm5, %v580_v63, 0.0  ;;  %v555_v4 = vmul.f32 0.6931472, %v1091_v1 }
 0x184   : > { %629 = vst.msk [vmem:[%s1559_s29 + $0x10] sm:$0xff] %vm626_vm3, %v612_v35  ;;  %v581_v34 = vsub.f32 %v553_v24, %v509_v23  ;;  %1100 = vlog2.f32 %v365_v0 }
 0x185   : > { %v1093_v5 = vpop.eup %1092  ;;  %v582_v59 = vsub.f32 %v555_v4, %v1548_v10  ;;  %1102 = vlog2.f32 %v368_v6 }
 0x186   : > { %v1095_v8 = vpop.eup %1094  ;;  %v613_v25 = vsel %vm597_vm6, %v581_v34, 0.0  ;;  %v557_v27 = vmul.f32 0.6931472, %v1093_v5  ;;  %v377_v37 = vpop.xlane.xlu1 %376 }
 0x187   : > { %v371_v31 = vpop.xlane.xlu0 %370  ;;  %630 = vst.msk [vmem:[%s1559_s29 + $0x18] sm:$0xff] %vm626_vm3, %v613_v25  ;;  %v614_v41 = vsel %vm598_vm7, %v582_v59, 0.0  ;;  %v559_v11 = vmul.f32 0.6931472, %v1095_v8  ;;  %1104 = vlog2.f32 %v377_v37 }
 0x188   : > { %631 = vst.msk [vmem:[%s1559_s29 + $0x20] sm:$0xff] %vm626_vm3, %v614_v41  ;;  %v583_v19 = vsub.f32 %v557_v27, %v1550_v21  ;;  %1106 = vlog2.f32 %v371_v31 }
 0x189   : > { %v1097_v43 = vpop.eup %1096  ;;  %v584_v3 = vsub.f32 %v559_v11, %v1552_v36 }
 0x18a   : > { %v615_v7 = vsel %vm599_vm8, %v583_v19, 0.0  ;;  %v561_v45 = vmul.f32 0.6931472, %v1097_v43  ;;  %v383_v22 = vpop.xlane.xlu1 %382  ;;  %v1099_v29 = vpop.eup %1098 }
 0x18b   : > { %v374_v18 = vpop.xlane.xlu0 %373  ;;  %632 = vst.msk [vmem:[%s1559_s29 + $0x28] sm:$0xff] %vm626_vm3, %v615_v7  ;;  %v616_v26 = vsel %vm600_vm9, %v584_v3, 0.0  ;;  %1108 = vlog2.f32 %v383_v22  ;;  %v563_v47 = vmul.f32 0.6931472, %v1099_v29 }
 0x18c   : > { %633 = vst.msk [vmem:[%s1559_s29 + $0x30] sm:$0xff] %vm626_vm3, %v616_v26  ;;  %v585_v49 = vsub.f32 %v561_v45, %v1554_v12  ;;  %1110 = vlog2.f32 %v374_v18 }
 0x18e   : > { %v1101_v32 = vpop.eup %1100  ;;  %v617_v44 = vsel %vm601_vm10, %v585_v49, 0.0  ;;  %v527_v40 = vpop.xlane.xlu1 %526 }
 0x18f   : > { %v380_v23 = vpop.xlane.xlu0 %379  ;;  %634 = vst.msk [vmem:[%s1559_s29 + $0x38] sm:$0xff] %vm626_vm3, %v617_v44  ;;  %v565_v10 = vmul.f32 0.6931472, %v1101_v32  ;;  %v1103_v21 = vpop.eup %1102 }
 0x190   : > { %1112 = vlog2.f32 %v380_v23  ;;  %v567_v55 = vmul.f32 0.6931472, %v1103_v21 }
 0x191   : > { %v1105_v52 = vpop.eup %1104  ;;  %v587_v36 = vsub.f32 %v565_v10, %v527_v40 }
 0x192   : > { %v1107_v48 = vpop.eup %1106  ;;  %v533_v12 = vpop.xlane.xlu1 %532  ;;  %v573_v9 = vmul.f32 0.6931472, %v1105_v52 }
 0x193   : > { %v524_v28 = vpop.xlane.xlu0 %523  ;;  %v619_v51 = vsel %vm603_vm11, %v587_v36, 0.0  ;;  %v569_v30 = vmul.f32 0.6931472, %v1107_v48 }
 0x194   : > { %v586_v39 = vsub.f32 %v563_v47, %v524_v28  ;;  %636 = vst.msk [vmem:[%s1559_s29 + $0x48] sm:$0xff] %vm626_vm3, %v619_v51 }
 0x195   : > { %v1109_v50 = vpop.eup %1108  ;;  %v589_v56 = vsub.f32 %v569_v30, %v533_v12 }
 0x196   : > { %v618_v53 = vsel %vm602_vm12, %v586_v39, 0.0  ;;  %v1111_v57 = vpop.eup %1110  ;;  %v539_v54 = vpop.xlane.xlu1 %538  ;;  %v577_v20 = vmul.f32 0.6931472, %v1109_v50 }
 0x197   : > { %635 = vst.msk [vmem:[%s1559_s29 + $0x40] sm:$0xff] %vm626_vm3, %v618_v53  ;;  %v530_v14 = vpop.xlane.xlu0 %529  ;;  %v621_v16 = vsel %vm605_vm13, %v589_v56, 0.0  ;;  %v591_v2 = vsub.f32 %v573_v9, %v539_v54  ;;  %v571_v33 = vmul.f32 0.6931472, %v1111_v57 }
 0x198   : > { %v588_v13 = vsub.f32 %v567_v55, %v530_v14  ;;  %638 = vst.msk [vmem:[%s1559_s29 + $0x58] sm:$0xff] %vm626_vm3, %v621_v16 }
 0x199   : > { %v623_v58 = vsel %vm607_vm14, %v591_v2, 0.0 }
 0x19a   : > { %v620_v15 = vsel %vm604_vm15, %v588_v13, 0.0  ;;  %v1113_v61 = vpop.eup %1112  ;;  %640 = vst.msk [vmem:[%s1559_s29 + $0x68] sm:$0xff] %vm626_vm3, %v623_v58  ;;  %v545_v38 = vpop.xlane.xlu1 %544 }
 0x19b   : > { %637 = vst.msk [vmem:[%s1559_s29 + $0x50] sm:$0xff] %vm626_vm3, %v620_v15  ;;  %v536_v60 = vpop.xlane.xlu0 %535  ;;  %v593_v63 = vsub.f32 %v577_v20, %v545_v38  ;;  %v575_v6 = vmul.f32 0.6931472, %v1113_v61 }
 0x19c   : > { %v590_v1 = vsub.f32 %v571_v33, %v536_v60 }
 0x19d   : > { %v625_v17 = vsel %vm609_vm1, %v593_v63, 0.0  ;;  %649 = sbr.rel (!%p1243_p4) target bundleno = 469 (0x1d5), region = 32 }
 0x19e   : > { %v622_v24 = vsel %vm606_vm2, %v590_v1, 0.0  ;;  %642 = vst.msk [vmem:[%s1559_s29 + $0x78] sm:$0xff] %vm626_vm3, %v625_v17 }
 0x19f   : > { %639 = vst.msk [vmem:[%s1559_s29 + $0x60] sm:$0xff] %vm626_vm3, %v622_v24  ;;  %v542_v0 = vpop.xlane.xlu0 %541 }
 0x1a0   : > { %v592_v35 = vsub.f32 %v575_v6, %v542_v0 }
 0x1a2   : > { %v624_v4 = vsel %vm608_vm0, %v592_v35, 0.0 }
 0x1a3   : > { %641 = vst.msk [vmem:[%s1559_s29 + $0x70] sm:$0xff] %vm626_vm3, %v624_v4 }
 0x1a4   : > { %s1722_s30 = smov (!%p652_p8, %s651_s30), 16 }
 0x1a5   : > { %s941_s7 = sshll.u32 %s1722_s30, 7 }
 0x1a6   : > { %p944_p9 = scmp.eq.s32.totalorder %s941_s7, 0 }
 0x1a7   : > { %s1624_s8 = sshrl.u32 (!%p944_p9), %s1722_s30, 4 }
 0x1a8   : > { %660 = sbr.rel (%p944_p9) target bundleno = 469 (0x1d5), region = 36  ;;  %p945_p10 = scmp.le.s32.totalorder (!%p944_p9), %s1624_s8, 0 }
 0x1af   : > { %880 = sbr.rel (%p945_p10) target bundleno = 448 (0x1c0), region = 115  ;;  %s1715_s9 = smov (!%p945_p10), %s1618_s6 }
 0x1b0   : > { %s1716_s11 = smov (!%p945_p10), %s1559_s29  ;;  %s1633_s12 = smov (!%p945_p10), 0  }
 0x1b1   : > { %s1635_s14 = smov (!%p945_p10), 0  }
 0x1b6 LB: >> { %v752_v42 = vld [vmem:[%s1176_s11] sm:$0xff]  ;;  %v754_v46 = vld [vmem:[%s1176_s11 + $0x8] sm:$0xff]  ;;  %v756_v62 = vld [vmem:[%s1176_s11 + $0x10] sm:$0xff]  ;;  %s784_s15 = sadd.s32 1, %s1180_s12  ;;  %s746_s14 = sadd.s32 1, %s1184_s14   ;;  %s1184_s14 = sphi %s1635_s14, %s746_s14   ;;  %s1180_s12 = sphi %s1633_s12, %s1717_s12   ;;  %s1176_s11 = sphi %s1716_s11, %s789_s11   ;;  %s1172_s9 = sphi %s1715_s9, %s790_s9  }
 0x1b7   : >> { %753 = vst [vmem:[%s1172_s9] sm:$0xff] %v752_v42  ;;  %755 = vst [vmem:[%s1172_s9 + $0x8] sm:$0xff] %v754_v46  ;;  %v758_v34 = vld [vmem:[%s1176_s11 + $0x18] sm:$0xff]  ;;  %v760_v5 = vld [vmem:[%s1176_s11 + $0x20] sm:$0xff]  ;;  %p785_p11 = scmp.ge.s32.totalorder %s784_s15, %s1624_s8  ;;  %p745_p12 = scmp.ge.s32.totalorder %s746_s14, %s1624_s8 }
 0x1b8   : >> { %757 = vst [vmem:[%s1172_s9 + $0x10] sm:$0xff] %v756_v62  ;;  %v762_v59 = vld [vmem:[%s1176_s11 + $0x28] sm:$0xff]  ;;  %759 = vst [vmem:[%s1172_s9 + $0x18] sm:$0xff] %v758_v34  ;;  %v764_v8 = vld [vmem:[%s1176_s11 + $0x30] sm:$0xff] }
 0x1b9   : >> { %761 = vst [vmem:[%s1172_s9 + $0x20] sm:$0xff] %v760_v5  ;;  %763 = vst [vmem:[%s1172_s9 + $0x28] sm:$0xff] %v762_v59  ;;  %v766_v25 = vld [vmem:[%s1176_s11 + $0x38] sm:$0xff]  ;;  %v768_v27 = vld [vmem:[%s1176_s11 + $0x40] sm:$0xff]  ;;  %s1724_s15 = smov (%p785_p11, %s784_s15), 0  ;;  %748 = sbr.rel (!%p745_p12) target bundleno = 438 (0x1b6), region = 121 }
 0x1ba   : >> { %765 = vst [vmem:[%s1172_s9 + $0x30] sm:$0xff] %v764_v8  ;;  %767 = vst [vmem:[%s1172_s9 + $0x38] sm:$0xff] %v766_v25  ;;  %v770_v37 = vld [vmem:[%s1176_s11 + $0x48] sm:$0xff]  ;;  %v772_v31 = vld [vmem:[%s1176_s11 + $0x50] sm:$0xff]  ;;  %s946_s17 = sshll.u32 %s1724_s15, 7  ;;  %s1717_s12 = smov %s1724_s15 }
 0x1bb   : >> { %769 = vst [vmem:[%s1172_s9 + $0x40] sm:$0xff] %v768_v27  ;;  %v774_v41 = vld [vmem:[%s1176_s11 + $0x58] sm:$0xff]  ;;  %771 = vst [vmem:[%s1172_s9 + $0x48] sm:$0xff] %v770_v37  ;;  %v776_v11 = vld [vmem:[%s1176_s11 + $0x60] sm:$0xff] }
 0x1bc   : >> { %773 = vst [vmem:[%s1172_s9 + $0x50] sm:$0xff] %v772_v31  ;;  %775 = vst [vmem:[%s1172_s9 + $0x58] sm:$0xff] %v774_v41  ;;  %v778_v19 = vld [vmem:[%s1176_s11 + $0x68] sm:$0xff]  ;;  %v780_v43 = vld [vmem:[%s1176_s11 + $0x70] sm:$0xff] }
 0x1bd   : >> { %777 = vst [vmem:[%s1172_s9 + $0x60] sm:$0xff] %v776_v11  ;;  %779 = vst [vmem:[%s1172_s9 + $0x68] sm:$0xff] %v778_v19  ;;  %v782_v3 = vld [vmem:[%s1176_s11 + $0x78] sm:$0xff]  ;;  %s789_s11 = scalar_lea.vmem %s1559_s29, %s946_s17 [#allocation2]  }
 0x1be   : >> { %781 = vst [vmem:[%s1172_s9 + $0x70] sm:$0xff] %v780_v43  ;;  %783 = vst [vmem:[%s1172_s9 + $0x78] sm:$0xff] %v782_v3  ;;  %s790_s9 = scalar_lea.vmem %s1618_s6, %s946_s17  }
 0x1c0 PF: > { %s1693_s18 = sand.u32 15, %s1722_s30   ;;  %s957_s19 = sshll.u32 %s1624_s8, 7 }
 0x1c1   : > { %s795_s20 = scalar_lea.vmem %s1559_s29, %s957_s19 [#allocation2]   ;;  %s797_s21 = scalar_lea.vmem %s1618_s6, %s957_s19  }
 0x1c2   : > { %p951_p13 = scmp.le.s32.totalorder %s1693_s18, 0 }
 0x1c3   : > { %s1186_s22 = smov (!%p951_p13), %s797_s21   ;;  %s1190_s23 = smov (!%p951_p13), %s795_s20  }
 0x1c4   : > { %894 = sbr.rel (%p951_p13) target bundleno = 469 (0x1d5), region = 126  ;;  %s1194_s24 = smov (!%p951_p13), 0  }
 0x1c5   : > { %s1198_s25 = smov (!%p951_p13), 0  }
 0x1cb LB: >> { %v807_v7 = vld [vmem:[%s1192_s23] sm:$0xff]  ;;  %s809_s26 = sadd.s32 1, %s1196_s24  ;;  %s801_s25 = sadd.s32 1, %s1200_s25   ;;  %s1200_s25 = sphi %s1198_s25, %s801_s25   ;;  %s1196_s24 = sphi %s1194_s24, %s1195_s24   ;;  %s1192_s23 = sphi %s1190_s23, %s814_s23   ;;  %s1188_s22 = sphi %s1186_s22, %s815_s22  }
 0x1cc   : >> { %808 = vst [vmem:[%s1188_s22] sm:$0xff] %v807_v7  ;;  %p810_p0 = scmp.ge.s32.totalorder %s809_s26, %s1693_s18  ;;  %p800_p1 = scmp.ge.s32.totalorder %s801_s25, %s1693_s18 }
 0x1ce   : >> { %s1726_s26 = smov (%p810_p0, %s809_s26), 0  ;;  %803 = sbr.rel (!%p800_p1) target bundleno = 459 (0x1cb), region = 132 }
 0x1cf   : >> { %s952_s27 = sshll.u32 %s1726_s26, 3  ;;  %s1195_s24 = smov %s1726_s26  }
 0x1d0   : >> { %s814_s23 = scalar_lea.vmem %s795_s20, %s952_s27 [#allocation2]   ;;  %s815_s22 = scalar_lea.vmem %s797_s21, %s952_s27  }
 0x1d5 PF: > { %p9_p2 = scmp.ge.s32.totalorder %s1233_s13, 4   ;;  %s1718_s9 = smov %s1164_s10 }
 0x1d6   : > { %s1719_s10 = smov %s1241_s16  ;;  %s1720_s11 = smov %s1233_s13 }
 0x1d7   :  { %11 = sbr.rel (!%p9_p2) target bundleno = 2 (0x2), region = 143 }

</bundles_post_ra>
